<compile_context>
chip_gen: v6e
topology: v6e:2x2x1
jax: 0.10.0
libtpu: 0.0.40
codegen_flags: <defaults>
</compile_context>

<pallas_src>
import math
import functools

import jax
import jax.numpy as jnp
from jax.experimental import pallas as pl
from jax.experimental.pallas import tpu as pltpu


LANES = 128


def _round_up(x, m):
    return ((x + m - 1) // m) * m


def _scaled_leaky_relu_kernel(x_ref, o_ref, *, pos_scale, neg_scale):
    # out = x * (sqrt(2) if x >= 0 else negative_slope * sqrt(2))
    # f32 compute with literal scale constants (single rounding for bf16 in).
    x = x_ref[...].astype(jnp.float32)
    y = x * jnp.where(x >= 0.0, pos_scale, neg_scale)
    o_ref[...] = y.astype(o_ref.dtype)


def scaled_leaky_relu(
    x,
    negative_slope=0.2,
    *,
    target_block_bytes=4 * 1024 * 1024,   # per-buffer tile size for large tensors
    small_bytes_threshold=1 * 1024 * 1024,  # below this: single block, no split
    min_grid_steps=4,                     # >=2 blocks/TC on v7x, >=3 steps v5e/v6e
):
    """Apply ScaledLeakyReLU elementwise via a Pallas TPU kernel."""
    orig_shape = x.shape
    orig_dtype = x.dtype

    if not jnp.issubdtype(orig_dtype, jnp.floating):
        raise TypeError(
            f"scaled_leaky_relu expects a floating dtype, got {orig_dtype}"
        )

    total = x.size
    if total == 0:
        return x

    itemsize = jnp.dtype(orig_dtype).itemsize
    # dtype-aware sublane multiple: 8 for f32, 16 for bf16/f16, 32 for fp8
    sublane = max(8, 32 // itemsize)

    x_flat = x.reshape(-1)

    # --- Lane-dense slab. Fast path: no padding when total % 128 == 0. ---
    pad = (-total) % LANES
    if pad:
        # Tiny pad (<= 127 elems). Safe: leaky_relu(0)*sqrt(2) == 0 and the
        # tail is sliced off below.
        x_flat = jnp.concatenate(
            [x_flat, jnp.zeros((pad,), dtype=orig_dtype)]
        )
    slab_total = total + pad
    rows = slab_total // LANES
    x2d = x_flat.reshape(rows, LANES)

    slab_bytes = slab_total * itemsize

    # --- Grid / tile selection (ragged last block handled by Pallas). ---
    if slab_bytes <= small_bytes_threshold or rows <= sublane:
        # One block covering the whole slab (block dims == full array dims,
        # so no (8,128) divisibility requirement on `rows`).
        tile_rows = rows
        grid_n = 1
    else:
        tile_rows = max(
            sublane,
            (target_block_bytes // (LANES * itemsize)) // sublane * sublane,
        )
        grid_n = pl.cdiv(rows, tile_rows)
        if grid_n < min_grid_steps:
            # Enough data to be worth pipelining / sharding across cores:
            # shrink tiles so we get at least `min_grid_steps` blocks.
            grid_n = min(min_grid_steps, pl.cdiv(rows, sublane))
            tile_rows = _round_up(pl.cdiv(rows, grid_n), sublane)
            grid_n = pl.cdiv(rows, tile_rows)

    block_bytes = tile_rows * LANES * itemsize
    # in + out, double-buffered, plus headroom. Safe on all generations
    # (v7x physical VMEM is 64 MiB; this stays far below).
    vmem_limit_bytes = min(4 * block_bytes + (4 << 20), 48 << 20)

    kernel = functools.partial(
        _scaled_leaky_relu_kernel,
        pos_scale=float(math.sqrt(2.0)),
        neg_scale=float(negative_slope) * float(math.sqrt(2.0)),
    )

    out2d = pl.pallas_call(
        kernel,
        out_shape=jax.ShapeDtypeStruct((rows, LANES), orig_dtype),
        grid_spec=pltpu.PrefetchScalarGridSpec(
            num_scalar_prefetch=0,
            grid=(grid_n,),
            in_specs=[pl.BlockSpec((tile_rows, LANES), lambda i: (i, 0))],
            out_specs=pl.BlockSpec((tile_rows, LANES), lambda i: (i, 0)),
        ),
        compiler_params=pltpu.CompilerParams(
            dimension_semantics=("parallel",),
            vmem_limit_bytes=vmem_limit_bytes,
        ),
        cost_estimate=pl.CostEstimate(
            flops=2 * slab_total,
            transcendentals=0,
            bytes_accessed=2 * slab_bytes,
        ),
    )(x2d)

    out_flat = out2d.reshape(-1)
    if pad:
        out_flat = out_flat[:total]
    return out_flat.reshape(orig_shape)


def _reference(x, negative_slope=0.2):
    return jnp.where(x >= 0, x, x * negative_slope) * math.sqrt(2.0)


if __name__ == "__main__":
    key = jax.random.PRNGKey(0)
    # NCHW input, small shapes: batch=2, channels=4, spatial=16x16
    x = jax.random.normal(key, (2, 4, 16, 16), dtype=jnp.float32)

    out = scaled_leaky_relu(x, negative_slope=0.2)
    out = jax.block_until_ready(out)

    ref = _reference(x, negative_slope=0.2)
    assert out.shape == x.shape
    assert out.dtype == x.dtype
    assert jnp.allclose(out, ref, atol=1e-6, rtol=1e-5)

    # Also exercise the multi-block (large) path and the ragged-tail fallback.
    x_big = jax.random.normal(key, (4, 64, 64, 64), dtype=jnp.float32)   # 4 MiB
    out_big = jax.block_until_ready(scaled_leaky_relu(x_big))
    assert jnp.allclose(out_big, _reference(x_big), atol=1e-6, rtol=1e-5)

    x_odd = jax.random.normal(key, (3, 5, 7), dtype=jnp.float32)  # 105 elems
    out_odd = jax.block_until_ready(scaled_leaky_relu(x_odd))
    assert jnp.allclose(out_odd, _reference(x_odd), atol=1e-6, rtol=1e-5)

    print("KERNEL_OK")
</pallas_src>

<mosaic_0001>
module attributes {stable_mosaic.version = 11 : i64} {
  func.func @_scaled_leaky_relu_kernel(%arg0: i32, %arg1: memref<16x128xf32, #tpu.memory_space<vmem>>, %arg2: memref<16x128xf32, #tpu.memory_space<vmem>>) attributes {dimension_semantics = [#tpu.dimension_semantics<parallel>], iteration_bounds = array<i64: 1>, scalar_prefetch = 0 : i64, scratch_operands = 0 : i64, tpu.core_type = #tpu.core_type<tc>, window_params = [{transform_indices = @transform_0, window_bounds = array<i64: 16, 128>}, {transform_indices = @transform_1, window_bounds = array<i64: 16, 128>}]} {
    %c0 = arith.constant 0 : index
    %c0_0 = arith.constant 0 : index
    %0 = vector.load %arg1[%c0, %c0_0] : memref<16x128xf32, #tpu.memory_space<vmem>>, vector<16x128xf32>
    %cst = arith.constant 0.000000e+00 : f32
    %1 = vector.broadcast %cst : f32 to vector<16x128xf32>
    %2 = arith.cmpf oge, %0, %1 : vector<16x128xf32>
    %cst_1 = arith.constant 1.41421354 : f32
    %cst_2 = arith.constant 0.282842726 : f32
    %3 = vector.broadcast %cst_1 : f32 to vector<16x128xf32>
    %4 = vector.broadcast %cst_2 : f32 to vector<16x128xf32>
    %5 = arith.select %2, %3, %4 : vector<16x128xi1>, vector<16x128xf32>
    %6 = arith.mulf %0, %5 : vector<16x128xf32>
    %c0_3 = arith.constant 0 : index
    %c0_4 = arith.constant 0 : index
    %7 = vector.load %arg2[%c0_3, %c0_4] : memref<16x128xf32, #tpu.memory_space<vmem>>, vector<16x128xf32>
    tpu.vector_store %arg2[%c0_3, %c0_4], %6 {strides = array<i32>} : memref<16x128xf32, #tpu.memory_space<vmem>>, vector<16x128xf32>,
    return
  }
  func.func @transform_0(%arg0: i32) -> (i32, i32) {
    %c0_i32 = arith.constant 0 : i32
    %c0_i32_0 = arith.constant 0 : i32
    return %arg0, %c0_i32 : i32, i32
  }
  func.func @transform_1(%arg0: i32) -> (i32, i32) {
    %c0_i32 = arith.constant 0 : i32
    %c0_i32_0 = arith.constant 0 : i32
    return %arg0, %c0_i32 : i32, i32
  }
}

</mosaic_0001>

<bundles_post_ra>
// kernel: tpu_custom_call.1
= control target key start
LH: loop header
LB: loop body
LE: loop exit
PB: predicated region body
PF: predicated region fallthrough
CT: control target
= control target key end

     0   :  { %6 = vsyncpa [#allocation3], 0  ;;  %s120_s0 = inlined_call_operand.hbm [shape: f32[16,128], index: 0, kind: input, shape index: {}]   ;;  %s121_s1 = inlined_call_operand.hbm [shape: f32[16,128], index: 1, kind: output, shape index: {}]  }
   0x1   :  { %7 = vsyncpa [#allocation4], 0  ;;  %s99_s6 = smov [#allocation2]  }
   0x2   :  { %s13_s7 = sshll.u32 %s99_s6, 4  ;;  %s14_s7 = int_to_ptr.vmem [resolvable:$true] %s13_s7 }
   0x3   :  { %s63_s8 = scalar_lea.vmem %s14_s7, 256  ;;  %p68_p1 = scmp.lt.s32.totalorder %s14_s7, %s14_s7 }
   0x4   :  { %p64_p0 = scmp.ne.s32.totalorder %s14_s7, %s63_s8  ;;  %p69_p2 = scmp.lt.s32.totalorder %s63_s8, %s63_s8 }
   0x6   :  { %p70_p3 = por %p69_p2, %p68_p1 }
   0x8   :  { %p71_p4 = pnand %p70_p3, %p64_p0 }
   0xa   :  { %74 = shalt.err (!%p71_p4)
}
   0xb   :  { %s100_s9 = smov 128   ;;  %s101_s10 = smov 8  }
   0xc   :  { %19 = dma.hbm_to_vmem [thread:$0]  %s120_s0, 256, %s14_s7, [#allocation3], %s100_s9, %s100_s9, %s101_s10  }
   0xd   :  { %95 = dma.done.wait [#allocation3], 256  }
   0xe   :  { %96 = vsyncadd [#allocation3], 4294967040  ;;  %v23_v0 = vld [vmem:[#allocation2] sm:$0xff]  ;;  %v24_v1 = vld [vmem:[#allocation2 + $0x8] sm:$0xff]  ;;  %s102_s13 = smov [#allocation5]  }
   0xf   :  { %s38_s14 = sshll.u32 %s102_s13, 4  ;;  %vm25_vm0 = vcmp.ge.f32.partialorder %v23_v0, 0.0  ;;  %vm26_vm1 = vcmp.ge.f32.partialorder %v24_v1, 0.0  ;;  %v103_v2 = vmov 0.28284273   ;;  %s39_s14 = int_to_ptr.vmem [resolvable:$true] %s38_s14 }
  0x10   :  { %v27_v3 = vsel %vm25_vm0, 1.4142135, %v103_v2  ;;  %v28_v4 = vsel %vm26_vm1, 1.4142135, %v103_v2  ;;  %s75_s15 = scalar_lea.vmem %s39_s14, 256  ;;  %p80_p6 = scmp.lt.s32.totalorder %s39_s14, %s39_s14 }
  0x11   :  { %v29_v5 = vmul.f32 %v27_v3, %v23_v0  ;;  %v30_v6 = vmul.f32 %v28_v4, %v24_v1  ;;  %p76_p5 = scmp.ne.s32.totalorder %s39_s14, %s75_s15  ;;  %p81_p7 = scmp.lt.s32.totalorder %s75_s15, %s75_s15 }
  0x13   :  { %31 = vst [vmem:[#allocation5] sm:$0xff] %v29_v5  ;;  %32 = vst [vmem:[#allocation5 + $0x8] sm:$0xff] %v30_v6  ;;  %p82_p8 = por %p81_p7, %p80_p6 }
  0x15   :  { %p83_p9 = pnand %p82_p8, %p76_p5 }
  0x17   :  { %86 = shalt.err (!%p83_p9)
}
  0x18   :  { %44 = dma.vmem_to_hbm [thread:$0]  %s39_s14, 256, %s121_s1, [#allocation4], %s100_s9, %s100_s9, %s101_s10  }
  0x19   :  { %97 = dma.done.wait [#allocation4], 256  }
  0x1a   :  { %98 = vsyncadd [#allocation4], 4294967040 }
  0x1b   :  { %48 = vsyncpa [#allocation3], 1 }
  0x1c   :  { %49 = vsyncpa [#allocation4], 1 }

</bundles_post_ra>
